<compile_context>
chip_gen: v6e
topology: v6e:2x2x1
jax: 0.10.0
libtpu: 0.0.40
codegen_flags: <defaults>
</compile_context>

<pallas_src>
import functools
import math

import jax
import jax.numpy as jnp
from jax import lax
from jax.experimental import pallas as pl
from jax.experimental.pallas import tpu as pltpu


def _round_up(n, m):
    return ((n + m - 1) // m) * m


def _gelu_exact(x):
    # Matches torch.nn.functional.gelu (default, erf-based).  erf runs on the
    # VPU; switch to jax.nn.gelu(approximate=True) (EUP tanh) only if the
    # accuracy contract allows deviating from torch's default.
    return 0.5 * x * (1.0 + lax.erf(x * (1.0 / math.sqrt(2.0))))


def _vmem_budget_bytes():
    """Generation-aware VMEM budget with headroom for compiler scratch."""
    try:
        cap = pltpu.get_tpu_info().vmem_capacity_bytes
    except Exception:
        cap = 64 * 1024 * 1024          # conservative (v7x-sized) fallback
    return int(cap - cap // 8)          # leave ~12.5% headroom


def _choose_tb(B, D, cbytes, obytes, avail_bytes):
    """Pick the batch-tile size.

    - bounded by leftover VMEM after the single-buffered resident weights
      (x tile and out tile are each double-buffered),
    - at least 2 grid steps whenever B >= 16 (v7x megacore sharding),
    - capped at 512 rows (fills the 256-row MXU passes, amortizes the
      ~0.35 us per-step overhead).
    """
    per_row = 2 * D * cbytes + 2 * D * obytes
    avail = max(avail_bytes, per_row * 8)
    tb_vmem = max(8, (avail // per_row) // 8 * 8)
    tb_split = _round_up(max(1, -(-B // 2)), 8)   # ceil(B/2), sublane-rounded
    return max(8, min(tb_vmem, 512, tb_split))


# ---------------------------------------------------------------------------
# Kernel
# ---------------------------------------------------------------------------
def _fan_kernel(x_ref, w1_ref, b1_ref, wo_ref, bo_ref, o_ref, *, p_width):
    """One (TB, D) batch tile.

    x_ref  : (TB, D)      input tile (compute dtype)
    w1_ref : (D,  P+G)    fused [freqs | Wg^T], zero-padded   (resident, 1-buf)
    b1_ref : (1,  P+G)    fused [0 | bg], f32                 (resident, 1-buf)
    wo_ref : (2P+G, D)    fused, offset-folded output weights (resident, 1-buf)
    bo_ref : (1,  D)      output bias, f32                    (resident, 1-buf)
    o_ref  : (TB, D)      output tile (x.dtype)
    """
    cdt = w1_ref.dtype

    # Stage 1: one lane-dense matmul producing both p and g_pre (f32 accum).
    t = jnp.dot(x_ref[...], w1_ref[...], preferred_element_type=jnp.float32)
    t = t + b1_ref[...]
    p = t[:, :p_width]                  # (TB, P)  lane-aligned static slice
    g = _gelu_exact(t[:, p_width:])     # (TB, G)

    # Stage 2: three MXU dots against sublane-aligned static slices of the
    # resident wo_ref (no VMEM fan-scratch round trip; phase offset already
    # folded into wo_ref so only sin(p)/cos(p) are needed).
    sin_p = jnp.sin(p).astype(cdt)
    cos_p = jnp.cos(p).astype(cdt)
    out = jnp.dot(sin_p, wo_ref[:p_width, :],
                  preferred_element_type=jnp.float32)
    out = out + jnp.dot(cos_p, wo_ref[p_width:2 * p_width, :],
                        preferred_element_type=jnp.float32)
    out = out + jnp.dot(g.astype(cdt), wo_ref[2 * p_width:, :],
                        preferred_element_type=jnp.float32)
    out = out + bo_ref[...]
    o_ref[...] = _gelu_exact(out).astype(o_ref.dtype)


# ---------------------------------------------------------------------------
# Parameter construction / packing
# ---------------------------------------------------------------------------
def init_raw_params(key, input_dim, hidden_dim=None):
    """Raw (PyTorch-layout, unpadded, f32) parameters."""
    if hidden_dim is None:
        hidden_dim = 2 * input_dim
    p_dim = hidden_dim // 4
    g_dim = hidden_dim // 2

    k = jax.random.split(key, 5)
    freqs = jax.random.normal(k[0], (input_dim, p_dim), jnp.float32) * 0.01
    offset = jnp.full((p_dim,), math.pi / 4.0, jnp.float32)

    bound_g = 1.0 / math.sqrt(input_dim)
    wg = jax.random.uniform(k[1], (g_dim, input_dim), jnp.float32, -bound_g, bound_g)
    bg = jax.random.uniform(k[2], (g_dim,), jnp.float32, -bound_g, bound_g)

    fan_in = 2 * p_dim + g_dim
    bound_o = 1.0 / math.sqrt(fan_in)
    wo = jax.random.uniform(k[3], (input_dim, fan_in), jnp.float32, -bound_o, bound_o)
    bo = jax.random.uniform(k[4], (input_dim,), jnp.float32, -bound_o, bound_o)

    return {"freqs": freqs, "offset": offset, "wg": wg, "bg": bg, "wo": wo, "bo": bo,
            "dims": (input_dim, p_dim, g_dim)}


def prepare_params(raw, compute_dtype=jnp.bfloat16):
    """Pad feature dims to multiples of 128, fuse stage-1 weights, and fold the
    phase offset into the output-projection weights."""
    input_dim, p_dim, g_dim = raw["dims"]

    D = _round_up(input_dim, 128)
    P = _round_up(p_dim, 128)
    G = _round_up(g_dim, 128)
    F1 = P + G           # width of the fused stage-1 output
    FI = 2 * P + G       # K of the fused stage-2 matmuls

    # Stage-1 fused weight: [freqs | Wg^T], zero padding elsewhere.
    w1 = jnp.zeros((D, F1), jnp.float32)
    w1 = w1.at[:input_dim, :p_dim].set(raw["freqs"])
    w1 = w1.at[:input_dim, P:P + g_dim].set(raw["wg"].T)
    b1 = jnp.zeros((1, F1), jnp.float32).at[0, P:P + g_dim].set(raw["bg"])

    # Offset folding for stage-2.
    wo_t = raw["wo"].T                           # (fan_in, input_dim)
    wo_cos = wo_t[:p_dim]
    wo_sin = wo_t[p_dim:2 * p_dim]
    wo_g = wo_t[2 * p_dim:]
    c_off = jnp.cos(raw["offset"])[:, None]
    s_off = jnp.sin(raw["offset"])[:, None]
    wo_s = c_off * (wo_sin - wo_cos)             # multiplies sin(p)
    wo_c = s_off * (wo_cos + wo_sin)             # multiplies cos(p)

    wo2 = jnp.zeros((FI, D), jnp.float32)
    wo2 = wo2.at[:p_dim, :input_dim].set(wo_s)
    wo2 = wo2.at[P:P + p_dim, :input_dim].set(wo_c)
    wo2 = wo2.at[2 * P:2 * P + g_dim, :input_dim].set(wo_g)
    bo2 = jnp.zeros((1, D), jnp.float32).at[0, :input_dim].set(raw["bo"])

    return {
        "w1": w1.astype(compute_dtype),
        "b1": b1,                                # biases stay f32
        "wo2": wo2.astype(compute_dtype),
        "bo2": bo2,
        "dims": (input_dim, D, P, G, F1, FI),
        "compute_dtype": compute_dtype,
    }


# ---------------------------------------------------------------------------
# Forward wrapper
# ---------------------------------------------------------------------------
def fan_phase_offset_forward(x, packed, tb=None):
    """x: (B, input_dim) or (input_dim,).  Returns (B, input_dim) in x.dtype."""
    input_dim, D, P, G, F1, FI = packed["dims"]
    compute_dtype = packed["compute_dtype"]

    if x.ndim == 1:
        x = x[None, :]
    B = x.shape[0]
    assert x.shape[1] == input_dim, "feature dim must match input_dim"
    # TODO(synk): PyTorch's runtime slice/zero-pad for mismatched feature dims
    # (plus logger.warning) has no dynamic-shape Pallas equivalent; we assert.

    cbytes = jnp.dtype(compute_dtype).itemsize
    out_dtype = x.dtype
    obytes = jnp.dtype(out_dtype).itemsize

    budget = _vmem_budget_bytes()
    weight_bytes = (D * F1 + FI * D) * cbytes + (F1 + D) * 4
    if weight_bytes > 0.6 * budget:
        # TODO(synk): re-tile F1 / FI with a second 'arbitrary' grid axis (plus
        # an f32 accumulator) instead of keeping all weights VMEM-resident.
        raise ValueError(
            f"Resident weights ({weight_bytes / 2**20:.1f} MiB) exceed 60% of "
            f"the VMEM budget ({budget / 2**20:.1f} MiB); input_dim too large "
            "for the fully-resident weight scheme.")

    if tb is None:
        tb = _choose_tb(B, D, cbytes, obytes, budget - weight_bytes)
    TB = max(8, _round_up(tb, 8))
    Bp = _round_up(B, TB)

    # No-copy fast path: skip the HBM pad pass when shapes are already aligned.
    if Bp == B and D == input_dim and x.dtype == compute_dtype:
        xp = x
    else:
        xp = jnp.zeros((Bp, D), compute_dtype).at[:B, :input_dim].set(
            x.astype(compute_dtype))

    kernel = functools.partial(_fan_kernel, p_width=P)

    def resident(shape):
        # Constant index_map -> single buffer is enough; halves weight VMEM.
        return pl.BlockSpec(shape, lambda i: (0, 0), pipeline_mode=pl.Buffered(1))

    out_p = pl.pallas_call(
        kernel,
        out_shape=jax.ShapeDtypeStruct((Bp, D), out_dtype),
        grid=(Bp // TB,),
        in_specs=[
            pl.BlockSpec((TB, D), lambda i: (i, 0)),   # x: streamed, double-buffered
            resident((D, F1)),                         # w1
            resident((1, F1)),                         # b1
            resident((FI, D)),                         # wo2
            resident((1, D)),                          # bo2
        ],
        out_specs=pl.BlockSpec((TB, D), lambda i: (i, 0)),
        compiler_params=pltpu.CompilerParams(
            dimension_semantics=("parallel",),
            vmem_limit_bytes=int(budget),
        ),
    )(xp, packed["w1"], packed["b1"], packed["wo2"], packed["bo2"])

    if Bp == B and D == input_dim:
        return out_p
    return out_p[:B, :input_dim]


# ---------------------------------------------------------------------------
# Plain-JAX reference (original, un-folded PyTorch math)
# ---------------------------------------------------------------------------
def reference_forward(x, raw):
    p = x @ raw["freqs"]
    g = _gelu_exact(x @ raw["wg"].T + raw["bg"])
    sin_out = jnp.sin(p + raw["offset"])
    cos_out = jnp.cos(p + math.pi / 2.0 - raw["offset"])
    fan = jnp.concatenate([cos_out, sin_out, g], axis=1)
    out = fan @ raw["wo"].T + raw["bo"]
    return _gelu_exact(out)


if __name__ == "__main__":
    key = jax.random.PRNGKey(0)
    k_param, k_x, k_x2 = jax.random.split(key, 3)

    input_dim = 32            # hidden_dim = 64 -> p_dim = 16, g_dim = 32
    raw = init_raw_params(k_param, input_dim)

    # --- f32 compute path: tight tolerance ---------------------------------
    packed_f32 = prepare_params(raw, compute_dtype=jnp.float32)

    # Single-tile case.
    x = jax.random.normal(k_x, (8, input_dim), jnp.float32)
    out = jax.block_until_ready(fan_phase_offset_forward(x, packed_f32))
    ref = reference_forward(x, raw)
    assert out.shape == (8, input_dim)
    assert jnp.allclose(out, ref, atol=1e-4, rtol=1e-4), (
        f"f32 single-tile max abs err {jnp.max(jnp.abs(out - ref))}")

    # Multi-step grid case (batch not a multiple of the tile; tb=8 -> 3 steps).
    x2 = jax.random.normal(k_x2, (20, input_dim), jnp.float32)
    out2 = jax.block_until_ready(fan_phase_offset_forward(x2, packed_f32, tb=8))
    ref2 = reference_forward(x2, raw)
    assert out2.shape == (20, input_dim)
    assert jnp.allclose(out2, ref2, atol=1e-4, rtol=1e-4), (
        f"f32 multi-step max abs err {jnp.max(jnp.abs(out2 - ref2))}")

    # --- bf16 compute path (default): looser tolerance, auto TB (2 steps) ---
    packed_bf16 = prepare_params(raw)   # compute_dtype defaults to bf16
    out3 = jax.block_until_ready(fan_phase_offset_forward(x2, packed_bf16))
    assert out3.shape == (20, input_dim)
    assert jnp.allclose(out3, ref2, atol=3e-2, rtol=3e-2), (
        f"bf16 max abs err {jnp.max(jnp.abs(out3 - ref2))}")

    print("KERNEL_OK")
</pallas_src>

<mosaic_0001>
module attributes {stable_mosaic.version = 11 : i64} {
  func.func @_fan_kernel(%arg0: i32, %arg1: memref<8x128xf32, #tpu.memory_space<vmem>>, %arg2: memref<128x256xf32, #tpu.memory_space<vmem>>, %arg3: memref<1x256xf32, #tpu.memory_space<vmem>>, %arg4: memref<384x128xf32, #tpu.memory_space<vmem>>, %arg5: memref<1x128xf32, #tpu.memory_space<vmem>>, %arg6: memref<8x128xf32, #tpu.memory_space<vmem>>) attributes {dimension_semantics = [#tpu.dimension_semantics<parallel>], iteration_bounds = array<i64: 1>, scalar_prefetch = 0 : i64, scratch_operands = 0 : i64, tpu.core_type = #tpu.core_type<tc>, window_params = [{transform_indices = @transform_0, window_bounds = array<i64: 8, 128>}, {pipeline_mode = #tpu.pipeline_mode<synchronous>, transform_indices = @transform_1, window_bounds = array<i64: 128, 256>}, {pipeline_mode = #tpu.pipeline_mode<synchronous>, transform_indices = @transform_2, window_bounds = array<i64: 1, 256>}, {pipeline_mode = #tpu.pipeline_mode<synchronous>, transform_indices = @transform_3, window_bounds = array<i64: 384, 128>}, {pipeline_mode = #tpu.pipeline_mode<synchronous>, transform_indices = @transform_4, window_bounds = array<i64: 1, 128>}, {transform_indices = @transform_5, window_bounds = array<i64: 8, 128>}]} {
    %c0 = arith.constant 0 : index
    %c0_0 = arith.constant 0 : index
    %0 = vector.load %arg1[%c0, %c0_0] : memref<8x128xf32, #tpu.memory_space<vmem>>, vector<8x128xf32>
    %c0_1 = arith.constant 0 : index
    %c0_2 = arith.constant 0 : index
    %1 = vector.load %arg2[%c0_1, %c0_2] : memref<128x256xf32, #tpu.memory_space<vmem>>, vector<128x256xf32>
    %cst = arith.constant dense<0.000000e+00> : vector<8x256xf32>
    %2 = tpu.matmul %0, %1, %cst {dimension_numbers = #tpu.dot_dimension_numbers<[1], [0], [0], [1], [0, 0, 1, 1], [], []>} : vector<8x128xf32>, vector<128x256xf32>, vector<8x256xf32> -> vector<8x256xf32>
    %c0_3 = arith.constant 0 : index
    %c0_4 = arith.constant 0 : index
    %3 = vector.load %arg3[%c0_3, %c0_4] : memref<1x256xf32, #tpu.memory_space<vmem>>, vector<1x256xf32>
    %4 = vector.broadcast %3 : vector<1x256xf32> to vector<8x256xf32>
    %5 = arith.addf %2, %4 : vector<8x256xf32>
    %6 = vector.extract_strided_slice %5 {offsets = [0, 0], sizes = [8, 128], strides = [1, 1]} : vector<8x256xf32> to vector<8x128xf32>
    %7 = vector.extract_strided_slice %5 {offsets = [0, 128], sizes = [8, 128], strides = [1, 1]} : vector<8x256xf32> to vector<8x128xf32>
    %cst_5 = arith.constant 5.000000e-01 : f32
    %8 = vector.broadcast %cst_5 : f32 to vector<8x128xf32>
    %9 = arith.mulf %8, %7 : vector<8x128xf32>
    %cst_6 = arith.constant 0.707106769 : f32
    %10 = vector.broadcast %cst_6 : f32 to vector<8x128xf32>
    %11 = arith.mulf %7, %10 : vector<8x128xf32>
    %12 = math.erf %11 : vector<8x128xf32>
    %cst_7 = arith.constant 1.000000e+00 : f32
    %13 = vector.broadcast %cst_7 : f32 to vector<8x128xf32>
    %14 = arith.addf %13, %12 : vector<8x128xf32>
    %15 = arith.mulf %9, %14 : vector<8x128xf32>
    %16 = math.sin %6 : vector<8x128xf32>
    %17 = math.cos %6 : vector<8x128xf32>
    %c0_8 = arith.constant 0 : index
    %c0_9 = arith.constant 0 : index
    %18 = vector.load %arg4[%c0_8, %c0_9] : memref<384x128xf32, #tpu.memory_space<vmem>>, vector<128x128xf32>
    %cst_10 = arith.constant dense<0.000000e+00> : vector<8x128xf32>
    %19 = tpu.matmul %16, %18, %cst_10 {dimension_numbers = #tpu.dot_dimension_numbers<[1], [0], [0], [1], [0, 0, 1, 1], [], []>} : vector<8x128xf32>, vector<128x128xf32>, vector<8x128xf32> -> vector<8x128xf32>
    %c128 = arith.constant 128 : index
    %c0_11 = arith.constant 0 : index
    %20 = vector.load %arg4[%c128, %c0_11] : memref<384x128xf32, #tpu.memory_space<vmem>>, vector<128x128xf32>
    %cst_12 = arith.constant dense<0.000000e+00> : vector<8x128xf32>
    %21 = tpu.matmul %17, %20, %cst_12 {dimension_numbers = #tpu.dot_dimension_numbers<[1], [0], [0], [1], [0, 0, 1, 1], [], []>} : vector<8x128xf32>, vector<128x128xf32>, vector<8x128xf32> -> vector<8x128xf32>
    %22 = arith.addf %19, %21 : vector<8x128xf32>
    %c256 = arith.constant 256 : index
    %c0_13 = arith.constant 0 : index
    %23 = vector.load %arg4[%c256, %c0_13] : memref<384x128xf32, #tpu.memory_space<vmem>>, vector<128x128xf32>
    %cst_14 = arith.constant dense<0.000000e+00> : vector<8x128xf32>
    %24 = tpu.matmul %15, %23, %cst_14 {dimension_numbers = #tpu.dot_dimension_numbers<[1], [0], [0], [1], [0, 0, 1, 1], [], []>} : vector<8x128xf32>, vector<128x128xf32>, vector<8x128xf32> -> vector<8x128xf32>
    %25 = arith.addf %22, %24 : vector<8x128xf32>
    %c0_15 = arith.constant 0 : index
    %c0_16 = arith.constant 0 : index
    %26 = vector.load %arg5[%c0_15, %c0_16] : memref<1x128xf32, #tpu.memory_space<vmem>>, vector<1x128xf32>
    %27 = vector.broadcast %26 : vector<1x128xf32> to vector<8x128xf32>
    %28 = arith.addf %25, %27 : vector<8x128xf32>
    %cst_17 = arith.constant 5.000000e-01 : f32
    %29 = vector.broadcast %cst_17 : f32 to vector<8x128xf32>
    %30 = arith.mulf %29, %28 : vector<8x128xf32>
    %cst_18 = arith.constant 0.707106769 : f32
    %31 = vector.broadcast %cst_18 : f32 to vector<8x128xf32>
    %32 = arith.mulf %28, %31 : vector<8x128xf32>
    %33 = math.erf %32 : vector<8x128xf32>
    %cst_19 = arith.constant 1.000000e+00 : f32
    %34 = vector.broadcast %cst_19 : f32 to vector<8x128xf32>
    %35 = arith.addf %34, %33 : vector<8x128xf32>
    %36 = arith.mulf %30, %35 : vector<8x128xf32>
    %c0_20 = arith.constant 0 : index
    %c0_21 = arith.constant 0 : index
    %37 = vector.load %arg6[%c0_20, %c0_21] : memref<8x128xf32, #tpu.memory_space<vmem>>, vector<8x128xf32>
    tpu.vector_store %arg6[%c0_20, %c0_21], %36 {strides = array<i32>} : memref<8x128xf32, #tpu.memory_space<vmem>>, vector<8x128xf32>,
    return
  }
  func.func @transform_0(%arg0: i32) -> (i32, i32) {
    %c0_i32 = arith.constant 0 : i32
    %c0_i32_0 = arith.constant 0 : i32
    return %arg0, %c0_i32 : i32, i32
  }
  func.func @transform_1(%arg0: i32) -> (i32, i32) {
    %c0_i32 = arith.constant 0 : i32
    %c0_i32_0 = arith.constant 0 : i32
    %c0_i32_1 = arith.constant 0 : i32
    return %c0_i32, %c0_i32_0 : i32, i32
  }
  func.func @transform_2(%arg0: i32) -> (i32, i32) {
    %c0_i32 = arith.constant 0 : i32
    %c0_i32_0 = arith.constant 0 : i32
    %c0_i32_1 = arith.constant 0 : i32
    return %c0_i32, %c0_i32_0 : i32, i32
  }
  func.func @transform_3(%arg0: i32) -> (i32, i32) {
    %c0_i32 = arith.constant 0 : i32
    %c0_i32_0 = arith.constant 0 : i32
    %c0_i32_1 = arith.constant 0 : i32
    return %c0_i32, %c0_i32_0 : i32, i32
  }
  func.func @transform_4(%arg0: i32) -> (i32, i32) {
    %c0_i32 = arith.constant 0 : i32
    %c0_i32_0 = arith.constant 0 : i32
    %c0_i32_1 = arith.constant 0 : i32
    return %c0_i32, %c0_i32_0 : i32, i32
  }
  func.func @transform_5(%arg0: i32) -> (i32, i32) {
    %c0_i32 = arith.constant 0 : i32
    %c0_i32_0 = arith.constant 0 : i32
    return %arg0, %c0_i32 : i32, i32
  }
}

</mosaic_0001>

<bundles_post_ra>
// kernel: tpu_custom_call.1
= control target key start
LH: loop header
LB: loop body
LE: loop exit
PB: predicated region body
PF: predicated region fallthrough
CT: control target
= control target key end

     0   :  { %10 = vsyncpa [#allocation3], 0  ;;  %s1104_s0 = inlined_call_operand.hbm [shape: f32[8,128], index: 0, kind: input, shape index: {}]   ;;  %s1105_s1 = inlined_call_operand.hbm [shape: f32[128,256], index: 1, kind: input, shape index: {}]   ;;  %s1106_s2 = inlined_call_operand.vmem [shape: f32[1,256], index: 2, kind: input, shape index: {}]   ;;  %s1107_s3 = inlined_call_operand.hbm [shape: f32[384,128], index: 3, kind: input, shape index: {}]   ;;  %s1108_s4 = inlined_call_operand.vmem [shape: f32[1,128], index: 4, kind: input, shape index: {}]   ;;  %s1109_s5 = inlined_call_operand.hbm [shape: f32[8,128], index: 5, kind: output, shape index: {}]  }
   0x1   :  { %11 = vsyncpa [#allocation6], 0 }
   0x2   :  { %12 = vsyncpa [#allocation4], 0  ;;  %s956_s18 = smov [#allocation5]  }
   0x3   :  { %s28_s19 = sshll.u32 %s956_s18, 4  ;;  %s29_s19 = int_to_ptr.vmem [resolvable:$true] %s28_s19 }
   0x4   :  { %s878_s20 = scalar_lea.vmem %s29_s19, 4096  ;;  %p883_p1 = scmp.lt.s32.totalorder %s29_s19, %s29_s19 }
   0x5   :  { %p879_p0 = scmp.ne.s32.totalorder %s29_s19, %s878_s20  ;;  %p884_p2 = scmp.lt.s32.totalorder %s878_s20, %s878_s20 }
   0x7   :  { %p885_p3 = por %p884_p2, %p883_p1 }
   0x9   :  { %p886_p4 = pnand %p885_p3, %p879_p0 }
   0xb   :  { %889 = shalt.err (!%p886_p4)
}
   0xc   :  { %s957_s21 = smov 256   ;;  %s958_s22 = smov 16  }
   0xd   :  { %34 = dma.hbm_to_vmem [thread:$0]  %s1105_s1, 4096, %s29_s19, [#allocation6], %s957_s21, %s957_s21, %s958_s22  }
   0xe   :  { %s959_s25 = smov [#allocation2]   ;;  %s960_s27 = smov [#allocation7]  }
   0xf   :  { %s19_s26 = sshll.u32 %s959_s25, 4  ;;  %s42_s28 = sshll.u32 %s960_s27, 4  ;;  %s20_s26 = int_to_ptr.vmem [resolvable:$true] %s19_s26  ;;  %s43_s28 = int_to_ptr.vmem [resolvable:$true] %s42_s28 }
  0x10   :  { %s898_s29 = scalar_lea.vmem %s20_s26, 128  ;;  %p903_p6 = scmp.lt.s32.totalorder %s20_s26, %s20_s26 }
  0x11   :  { %p899_p5 = scmp.ne.s32.totalorder %s20_s26, %s898_s29  ;;  %p904_p7 = scmp.lt.s32.totalorder %s898_s29, %s898_s29 }
  0x13   :  { %p905_p8 = por %p904_p7, %p903_p6 }
  0x15   :  { %p906_p9 = pnand %p905_p8, %p899_p5 }
  0x17   :  { %909 = shalt.err (!%p906_p9)
}
  0x18   :  { %22 = dma.hbm_to_vmem [thread:$0]  %s1104_s0, 128, %s20_s26, [#allocation3]  }
  0x19   :  { %s918_s7 = scalar_lea.vmem %s43_s28, 6144  ;;  %p923_p11 = scmp.lt.s32.totalorder %s43_s28, %s43_s28 }
  0x1a   :  { %p919_p10 = scmp.ne.s32.totalorder %s43_s28, %s918_s7  ;;  %p924_p12 = scmp.lt.s32.totalorder %s918_s7, %s918_s7 }
  0x1c   :  { %p925_p13 = por %p924_p12, %p923_p11 }
  0x1e   :  { %p926_p0 = pnand %p925_p13, %p919_p10 }
  0x20   :  { %929 = shalt.err (!%p926_p0)
}
  0x21   :  { %s961_s1 = smov 128   ;;  %s962_s8 = smov 8  }
  0x22   :  { %48 = dma.hbm_to_vmem [thread:$0]  %s1107_s3, 6144, %s43_s28, [#allocation6], %s961_s1, %s961_s1, %s962_s8  }
  0x23   :  { %950 = dma.done.wait [#allocation3], 128  }
  0x24   :  { %951 = vsyncadd [#allocation3], 4294967168 }
  0x25   :  { %952 = dma.done.wait [#allocation6], 10240  }
  0x26   :  { %953 = vsyncadd [#allocation6], 4294957056  ;;  %v963_v0 = vmov 0.0   ;;  %v92_v1 = vld [vmem:[#allocation5 + $0xf8] sm:$0xff]  ;;  %v91_v2 = vld [vmem:[#allocation5 + $0xf0] sm:$0xff]  ;;  %vm964_vm0 = vmmov 0  }
  0x27   :  { %169 = vmatprep.mubr.f32.mxu0 %v963_v0  ;;  %737 = vmatprep.subr.mxu1 %v963_v0  ;;  %v90_v3 = vld [vmem:[#allocation5 + $0xe8] sm:$0xff]  ;;  %v89_v4 = vld [vmem:[#allocation5 + $0xe0] sm:$0xff]  ;;  %v88_v5 = vld [vmem:[#allocation5 + $0xd8] sm:$0xff]  ;;  %s971_s12 = smov [#allocation8]  }
  0x28   :  { %105 = vmatprep.subr.mxu0 %v92_v1  ;;  %v87_v6 = vld [vmem:[#allocation5 + $0xd0] sm:$0xff]  ;;  %v86_v7 = vld [vmem:[#allocation5 + $0xc8] sm:$0xff]  ;;  %v85_v8 = vld [vmem:[#allocation5 + $0xc0] sm:$0xff]  ;;  %769 = vmatprep.mubr.msk.f32.mxu1 %vm964_vm0, %v963_v0  ;;  %s667_s13 = sshll.u32 %s971_s12, 4  ;;  %s668_s13 = int_to_ptr.vmem [resolvable:$true] %s667_s13 }
  0x29   :  { %106 = vmatpush1.msra.mxu0 %v91_v2  ;;  %v84_v9 = vld [vmem:[#allocation5 + $0xb8] sm:$0xff]  ;;  %v83_v10 = vld [vmem:[#allocation5 + $0xb0] sm:$0xff]  ;;  %v82_v11 = vld [vmem:[#allocation5 + $0xa8] sm:$0xff]  ;;  %s930_s14 = scalar_lea.vmem %s668_s13, 128  ;;  %p935_p2 = scmp.lt.s32.totalorder %s668_s13, %s668_s13 }
  0x2a   :  { %107 = vmatprep.subr.mxu0 %v90_v3  ;;  %v81_v12 = vld [vmem:[#allocation5 + $0xa0] sm:$0xff]  ;;  %v80_v13 = vld [vmem:[#allocation5 + $0x98] sm:$0xff]  ;;  %v79_v14 = vld [vmem:[#allocation5 + $0x90] sm:$0xff]  ;;  %v95_v3 = vlaneseq  ;;  %p931_p1 = scmp.ne.s32.totalorder %s668_s13, %s930_s14  ;;  %p936_p3 = scmp.lt.s32.totalorder %s930_s14, %s930_s14 }
  0x2b   :  { %108 = vmatpush1.msra.mxu0 %v89_v4  ;;  %v78_v15 = vld [vmem:[#allocation5 + $0x88] sm:$0xff]  ;;  %v77_v16 = vld [vmem:[#allocation5 + $0x80] sm:$0xff]  ;;  %v76_v17 = vld [vmem:[#allocation5 + $0x78] sm:$0xff] }
  0x2c   :  { %109 = vmatprep.subr.mxu0 %v88_v5  ;;  %v75_v18 = vld [vmem:[#allocation5 + $0x70] sm:$0xff]  ;;  %v74_v19 = vld [vmem:[#allocation5 + $0x68] sm:$0xff]  ;;  %v73_v20 = vld [vmem:[#allocation5 + $0x60] sm:$0xff]  ;;  %v1049_v4 = vshrl.u32 %v95_v3, 7  ;;  %p937_p4 = por %p936_p3, %p935_p2 }
  0x2d   :  { %110 = vmatpush1.msra.mxu0 %v87_v6  ;;  %v72_v21 = vld [vmem:[#allocation5 + $0x58] sm:$0xff]  ;;  %v71_v22 = vld [vmem:[#allocation5 + $0x50] sm:$0xff]  ;;  %v70_v23 = vld [vmem:[#allocation5 + $0x48] sm:$0xff] }
  0x2e   :  { %111 = vmatprep.subr.mxu0 %v86_v7  ;;  %v69_v24 = vld [vmem:[#allocation5 + $0x40] sm:$0xff]  ;;  %v68_v25 = vld [vmem:[#allocation5 + $0x38] sm:$0xff]  ;;  %v67_v26 = vld [vmem:[#allocation5 + $0x30] sm:$0xff]  ;;  %v97_v5 = vsub.s32 0, %v1049_v4  ;;  %p938_p5 = pnand %p937_p4, %p931_p1 }
  0x2f   :  { %112 = vmatpush1.msra.mxu0 %v85_v8  ;;  %v66_v27 = vld [vmem:[#allocation5 + $0x28] sm:$0xff]  ;;  %v65_v28 = vld [vmem:[#allocation5 + $0x20] sm:$0xff]  ;;  %v64_v29 = vld [vmem:[#allocation5 + $0x18] sm:$0xff] }
  0x30   :  { %113 = vmatprep.subr.mxu0 %v84_v9  ;;  %v63_v30 = vld [vmem:[#allocation5 + $0x10] sm:$0xff]  ;;  %v62_v31 = vld [vmem:[#allocation5 + $0x8] sm:$0xff]  ;;  %v61_v32 = vld [vmem:[#allocation5] sm:$0xff] }
  0x31   :  { %114 = vmatpush1.msra.mxu0 %v83_v10  ;;  %v60_v33 = vld [vmem:[#allocation2] sm:$0xff]  ;;  %v418_v36 = vld [vmem:[#allocation7 + $0xf0] sm:$0xff]  ;;  %v417_v38 = vld [vmem:[#allocation7 + $0xe8] sm:$0xff] }
  0x32   :  { %115 = vmatprep.subr.mxu0 %v82_v11  ;;  %v419_v34 = vld [vmem:[#allocation7 + $0xf8] sm:$0xff]  ;;  %v402_v37 = vld [vmem:[#allocation7 + $0x70] sm:$0xff]  ;;  %v401_v39 = vld [vmem:[#allocation7 + $0x68] sm:$0xff] }
  0x33   :  { %116 = vmatpush1.msra.mxu0 %v81_v12  ;;  %738 = vmatpush3.msra.mxu1 %v419_v34  ;;  %v403_v35 = vld [vmem:[#allocation7 + $0x78] sm:$0xff]  ;;  %v416_v40 = vld [vmem:[#allocation7 + $0xe0] sm:$0xff]  ;;  %v414_v44 = vld [vmem:[#allocation7 + $0xd0] sm:$0xff]  ;;  %v970_v34 = vmov 1326507024  }
  0x34   :  { %117 = vmatprep.subr.mxu0 %v80_v13  ;;  %739 = vmatprep.subr.mxu1 %v963_v0  ;;  %v400_v41 = vld [vmem:[#allocation7 + $0x60] sm:$0xff]  ;;  %v415_v42 = vld [vmem:[#allocation7 + $0xd8] sm:$0xff]  ;;  %v398_v45 = vld [vmem:[#allocation7 + $0x50] sm:$0xff] }
  0x35   :  { %118 = vmatpush1.msra.mxu0 %v79_v14  ;;  %740 = vmatpush3.msra.mxu1 %v418_v36  ;;  %v399_v43 = vld [vmem:[#allocation7 + $0x58] sm:$0xff]  ;;  %v413_v46 = vld [vmem:[#allocation7 + $0xc8] sm:$0xff]  ;;  %v412_v48 = vld [vmem:[#allocation7 + $0xc0] sm:$0xff] }
  0x36   :  { %119 = vmatprep.subr.mxu0 %v78_v15  ;;  %741 = vmatprep.subr.mxu1 %v963_v0  ;;  %v397_v47 = vld [vmem:[#allocation7 + $0x48] sm:$0xff]  ;;  %v396_v49 = vld [vmem:[#allocation7 + $0x40] sm:$0xff]  ;;  %v411_v50 = vld [vmem:[#allocation7 + $0xb8] sm:$0xff] }
  0x37   :  { %120 = vmatpush1.msra.mxu0 %v77_v16  ;;  %742 = vmatpush3.msra.mxu1 %v417_v38  ;;  %v395_v51 = vld [vmem:[#allocation7 + $0x38] sm:$0xff]  ;;  %v410_v52 = vld [vmem:[#allocation7 + $0xb0] sm:$0xff]  ;;  %v409_v54 = vld [vmem:[#allocation7 + $0xa8] sm:$0xff] }
  0x38   :  { %121 = vmatprep.subr.mxu0 %v76_v17  ;;  %743 = vmatprep.subr.mxu1 %v963_v0  ;;  %v394_v53 = vld [vmem:[#allocation7 + $0x30] sm:$0xff]  ;;  %v393_v55 = vld [vmem:[#allocation7 + $0x28] sm:$0xff]  ;;  %v408_v56 = vld [vmem:[#allocation7 + $0xa0] sm:$0xff] }
  0x39   :  { %122 = vmatpush1.msra.mxu0 %v75_v18  ;;  %744 = vmatpush3.msra.mxu1 %v416_v40  ;;  %v392_v57 = vld [vmem:[#allocation7 + $0x20] sm:$0xff]  ;;  %v407_v58 = vld [vmem:[#allocation7 + $0x98] sm:$0xff]  ;;  %v406_v60 = vld [vmem:[#allocation7 + $0x90] sm:$0xff] }
  0x3a   :  { %123 = vmatprep.subr.mxu0 %v74_v19  ;;  %745 = vmatprep.subr.mxu1 %v963_v0  ;;  %v391_v59 = vld [vmem:[#allocation7 + $0x18] sm:$0xff]  ;;  %v390_v61 = vld [vmem:[#allocation7 + $0x10] sm:$0xff]  ;;  %v405_v62 = vld [vmem:[#allocation7 + $0x88] sm:$0xff] }
  0x3b   :  { %124 = vmatpush1.msra.mxu0 %v73_v20  ;;  %746 = vmatpush3.msra.mxu1 %v415_v42  ;;  %v389_v63 = vld [vmem:[#allocation7 + $0x8] sm:$0xff]  ;;  %v404_v1 = vld [vmem:[#allocation7 + $0x80] sm:$0xff]  ;;  %v1055_v6 = vld [vmem:[%s1106_s2] sm:$0x3]  ;;  %v965_v20 = vmov 683565275  }
  0x3c   :  { %125 = vmatprep.subr.mxu0 %v72_v21  ;;  %747 = vmatprep.subr.mxu1 %v963_v0  ;;  %v388_v2 = vld [vmem:[#allocation7] sm:$0xff]  ;;  %v98_v7 = vrot.slane %v1055_v6, %v97_v5 }
  0x3d   :  { %126 = vmatpush1.msra.mxu0 %v71_v22  ;;  %748 = vmatpush3.msra.mxu1 %v414_v44  ;;  %v966_v22 = vmov 2475754826  }
  0x3e   :  { %127 = vmatprep.subr.mxu0 %v70_v23  ;;  %749 = vmatprep.subr.mxu1 %v963_v0 }
  0x3f   :  { %128 = vmatpush1.msra.mxu0 %v69_v24  ;;  %750 = vmatpush3.msra.mxu1 %v413_v46 }
  0x40   :  { %129 = vmatprep.subr.mxu0 %v68_v25  ;;  %751 = vmatprep.subr.mxu1 %v963_v0  ;;  %v967_v25 = vmov 2131351028  }
  0x41   :  { %130 = vmatpush1.msra.mxu0 %v67_v26  ;;  %752 = vmatpush3.msra.mxu1 %v412_v48 }
  0x42   :  { %131 = vmatprep.subr.mxu0 %v66_v27  ;;  %753 = vmatprep.subr.mxu1 %v963_v0 }
  0x43   :  { %132 = vmatpush1.msra.mxu0 %v65_v28  ;;  %754 = vmatpush3.msra.mxu1 %v411_v50  ;;  %v968_v28 = vmov 2102212464  }
  0x44   :  { %133 = vmatprep.subr.mxu0 %v64_v29  ;;  %755 = vmatprep.subr.mxu1 %v963_v0 }
  0x45   :  { %134 = vmatpush1.msra.mxu0 %v63_v30  ;;  %756 = vmatpush3.msra.mxu1 %v410_v52 }
  0x46   :  { %135 = vmatprep.subr.mxu0 %v62_v31  ;;  %757 = vmatprep.subr.mxu1 %v963_v0  ;;  %v969_v31 = vmov 920167782  }
  0x47   :  { %136 = vmatpush1.msra.mxu0 %v61_v32  ;;  %758 = vmatpush3.msra.mxu1 %v409_v54 }
  0x48   :  { %170 = vmatmul.mubr.f32.vlgmr.msra.gmra.mxu0 %v60_v33  ;;  %772 = vmatprep.subr.mxu0 %v963_v0 }
  0x49   :  { %773 = vmatpush3.msra.mxu0 %v403_v35  ;;  %759 = vmatprep.subr.mxu1 %v963_v0 }
  0x4a   :  { %774 = vmatprep.subr.mxu0 %v963_v0  ;;  %760 = vmatpush3.msra.mxu1 %v408_v56 }
  0x4b   :  { %775 = vmatpush3.msra.mxu0 %v402_v37  ;;  %761 = vmatprep.subr.mxu1 %v963_v0 }
  0x4c   :  { %776 = vmatprep.subr.mxu0 %v963_v0  ;;  %762 = vmatpush3.msra.mxu1 %v407_v58 }
  0x4d   :  { %777 = vmatpush3.msra.mxu0 %v401_v39  ;;  %763 = vmatprep.subr.mxu1 %v963_v0 }
  0x4e   :  { %778 = vmatprep.subr.mxu0 %v963_v0  ;;  %764 = vmatpush3.msra.mxu1 %v406_v60 }
  0x4f   :  { %779 = vmatpush3.msra.mxu0 %v400_v41  ;;  %765 = vmatprep.subr.mxu1 %v963_v0 }
  0x50   :  { %780 = vmatprep.subr.mxu0 %v963_v0  ;;  %766 = vmatpush3.msra.mxu1 %v405_v62 }
  0x51   :  { %781 = vmatpush3.msra.mxu0 %v399_v43  ;;  %767 = vmatprep.subr.mxu1 %v963_v0 }
  0x52   :  { %782 = vmatprep.subr.mxu0 %v963_v0  ;;  %768 = vmatpush3.msra.mxu1 %v404_v1 }
  0x53   :  { %783 = vmatpush3.msra.mxu0 %v398_v45  ;;  %804 = vmatprep.mubr.msk.f32.mxu0 %vm964_vm0, %v963_v0 }
  0x54   :  { %784 = vmatprep.subr.mxu0 %v963_v0  ;;  %807 = vmatprep.subr.mxu1 %v963_v0 }
  0x55   :  { %785 = vmatpush3.msra.mxu0 %v397_v47 }
  0x56   :  { %786 = vmatprep.subr.mxu0 %v963_v0 }
  0x57   :  { %787 = vmatpush3.msra.mxu0 %v396_v49 }
  0x58   :  { %788 = vmatprep.subr.mxu0 %v963_v0 }
  0x59   :  { %789 = vmatpush3.msra.mxu0 %v395_v51 }
  0x5a   :  { %790 = vmatprep.subr.mxu0 %v963_v0 }
  0x5b   :  { %791 = vmatpush3.msra.mxu0 %v394_v53 }
  0x5c   :  { %792 = vmatprep.subr.mxu0 %v963_v0 }
  0x5d   :  { %793 = vmatpush3.msra.mxu0 %v393_v55 }
  0x5e   :  { %794 = vmatprep.subr.mxu0 %v963_v0 }
  0x5f   :  { %795 = vmatpush3.msra.mxu0 %v392_v57 }
  0x60   :  { %796 = vmatprep.subr.mxu0 %v963_v0 }
  0x61   :  { %797 = vmatpush3.msra.mxu0 %v391_v59 }
  0x62   :  { %798 = vmatprep.subr.mxu0 %v963_v0 }
  0x63   :  { %799 = vmatpush3.msra.mxu0 %v390_v61 }
  0x64   :  { %800 = vmatprep.subr.mxu0 %v963_v0 }
  0x65   :  { %801 = vmatpush3.msra.mxu0 %v389_v63 }
  0x66   :  { %802 = vmatprep.subr.mxu0 %v963_v0 }
  0x67   :  { %803 = vmatpush3.msra.mxu0 %v388_v2 }
 0x108   :  { %v171_v8 = vpop.f32.mrf.mxu0 }
 0x109   :  { %v1058_v9 = vadd.f32 %v171_v8, %v98_v7 }
 0x10b   :  { %v184_v10 = vand.u32 2139095040, %v1058_v9  ;;  %v181_v14 = vand.u32 2147483647, %v1058_v9  ;;  %vm183_vm8 = vcmp.lt.s32.totalorder %v1058_v9, 0 }
 0x10d   :  { %v185_v11 = vshrl.u32 %v184_v10, 23  ;;  %v188_v17 = vand.u32 8388607, %v181_v14  ;;  %vm182_vm9 = vcmp.le.f32.partialorder %v181_v14, 0.7853982 }
 0x10f   :  { %v677_v12 = vadd.s32 4294967169, %v185_v11  ;;  %v189_v36 = vor.u32 8388608, %v188_v17 }
 0x111   :  { %v191_v13 = vadd.s32 1, %v677_v12  ;;  %v229_v50 = vshll.u32 %v189_v36, 8 }
 0x113   :  { %vm192_vm1 = vcmp.gt.s32.totalorder %v191_v13, 0 }
 0x114   :  { %v193_v15 = vsel %vm192_vm1, %v191_v13, 0  ;;  %vm273_vm1 = vweird.f32 %v1058_v9 }
 0x115   :  { %v195_v16 = vand.u32 31, %v193_v15  ;;  %v194_v19 = vshrl.u32 %v193_v15, 5 }
 0x117   :  { %v196_v18 = vsub.s32 32, %v195_v16  ;;  %v198_v21 = vshll.u32 %v965_v20, %v195_v16  ;;  %v201_v23 = vshll.u32 %v966_v22, %v195_v16  ;;  %v204_v27 = vshll.u32 %v967_v25, %v195_v16 }
 0x118   :  { %v207_v30 = vshll.u32 %v968_v28, %v195_v16  ;;  %v210_v33 = vshll.u32 %v969_v31, %v195_v16  ;;  %vm213_vm2 = vcmp.lt.s32.totalorder %v194_v19, 1  ;;  %vm216_vm3 = vcmp.lt.s32.totalorder %v194_v19, 4 }
 0x119   :  { %v199_v24 = vshrl.u32 %v966_v22, %v196_v18  ;;  %v202_v26 = vshrl.u32 %v967_v25, %v196_v18  ;;  %v205_v29 = vshrl.u32 %v968_v28, %v196_v18  ;;  %v208_v32 = vshrl.u32 %v969_v31, %v196_v18 }
 0x11a   :  { %v211_v35 = vshrl.u32 %v970_v34, %v196_v18  ;;  %v197_v45 = vshrl.u32 %v965_v20, %v196_v18  ;;  %vm215_vm4 = vcmp.lt.s32.totalorder %v194_v19, 3  ;;  %vm214_vm5 = vcmp.lt.s32.totalorder %v194_v19, 2 }
 0x11b   :  { %v200_v37 = vor.u32 %v199_v24, %v198_v21  ;;  %v203_v38 = vor.u32 %v202_v26, %v201_v23  ;;  %v206_v39 = vor.u32 %v205_v29, %v204_v27  ;;  %v209_v40 = vor.u32 %v208_v32, %v207_v30 }
 0x11c   :  { %v212_v41 = vor.u32 %v211_v35, %v210_v33 }
 0x11d   :  { %v218_v42 = vsel %vm216_vm3, %v206_v39, 2102212464  ;;  %v221_v43 = vsel %vm213_vm2, %v200_v37, %v203_v38  ;;  %v225_v44 = vsel %vm213_vm2, %v203_v38, %v206_v39  ;;  %v222_v46 = vsel %vm216_vm3, %v209_v40, 920167782 }
 0x11e   :  { %v226_v47 = vsel %vm216_vm3, %v212_v41, 1326507024  ;;  %v223_v48 = vsel %vm215_vm4, %v206_v39, %v222_v46  ;;  %v217_v51 = vsel %vm213_vm2, %v197_v45, %v200_v37  ;;  %v219_v52 = vsel %vm215_vm4, %v203_v38, %v218_v42  ;;  %v575_v46 = vld [vmem:[#allocation7 + $0x178] sm:$0xff] }
 0x11f   :  { %v227_v49 = vsel %vm215_vm4, %v209_v40, %v226_v47  ;;  %v224_v53 = vsel %vm214_vm5, %v221_v43, %v223_v48  ;;  %v220_v59 = vsel %vm214_vm5, %v217_v51, %v219_v52  ;;  %v101_v37 = vsub.s32 1, %v1049_v4  ;;  %v173_v4 = vpop.f32.mrf.mxu0  ;;  %v573_v51 = vld [vmem:[#allocation7 + $0x168] sm:$0xff]  ;;  %v571_v52 = vld [vmem:[#allocation7 + $0x158] sm:$0xff] }
 0x120   :  { %v228_v54 = vsel %vm214_vm5, %v225_v44, %v227_v49  ;;  %v1067_v57 = vmul.u32.u64.low %v229_v50, %v224_v53  ;;  %v1068_v58 = vmul.u32.u64.high %v229_v50, %v224_v53, %v1067_v57  ;;  %v236_v61 = vmul.u32 %v229_v50, %v220_v59  ;;  %v574_v49 = vld [vmem:[#allocation7 + $0x170] sm:$0xff]  ;;  %v564_v59 = vld [vmem:[#allocation7 + $0x120] sm:$0xff] }
 0x121   :  { %v1064_v55 = vmul.u32.u64.low %v229_v50, %v228_v54  ;;  %v1065_v56 = vmul.u32.u64.high %v229_v50, %v228_v54, %v1064_v55  ;;  %v102_v43 = vrot.slane %v1055_v6, %v101_v37  ;;  %v572_v6 = vld [vmem:[#allocation7 + $0x160] sm:$0xff]  ;;  %v570_v53 = vld [vmem:[#allocation7 + $0x150] sm:$0xff]  ;;  %v569_v54 = vld [vmem:[#allocation7 + $0x148] sm:$0xff] }
 0x122   :  { %v239_v60 = vadd.s32 1, %v1068_v58  ;;  %v568_v55 = vld [vmem:[#allocation7 + $0x140] sm:$0xff] }
 0x123   :  { %vm238_vm6 = vc.u32 %v1065_v56, %v1067_v57  ;;  %v237_v13 = vadd.s32 %v1067_v57, %v1065_v56  ;;  %v174_v50 = vadd.f32 %v173_v4, %v102_v43  ;;  %v567_v56 = vld [vmem:[#allocation7 + $0x138] sm:$0xff]  ;;  %v566_v57 = vld [vmem:[#allocation7 + $0x130] sm:$0xff] }
 0x124   :  { %v240_v62 = vsel %vm238_vm6, %v239_v60, %v1068_v58  ;;  %v565_v58 = vld [vmem:[#allocation7 + $0x128] sm:$0xff]  ;;  %v563_v60 = vld [vmem:[#allocation7 + $0x118] sm:$0xff] }
 0x125   :  { %v241_v63 = vadd.s32 %v240_v62, %v236_v61  ;;  %v562_v62 = vld [vmem:[#allocation7 + $0x110] sm:$0xff] }
 0x127   :  { %v242_v1 = vadd.s32 536870912, %v241_v63 }
 0x129   :  { %v243_v2 = vshrl.u32 %v242_v1, 30  ;;  %v561_v1 = vld [vmem:[#allocation7 + $0x108] sm:$0xff] }
 0x12b   :  { %v244_v3 = vshll.u32 %v243_v2, 30  ;;  %v267_v27 = vsub.s32 4, %v243_v2 }
 0x12d   :  { %v245_v5 = vsub.s32 %v241_v63, %v244_v3  ;;  %v268_v30 = vsel %vm183_vm8, %v267_v27, %v243_v2  ;;  %v176_v2 = vmul.f32 0.5, %v174_v50  ;;  %v560_v3 = vld [vmem:[#allocation7 + $0x100] sm:$0xff] }
 0x12e   :  { %v270_v31 = vsel %vm182_vm9, 0, %v268_v30 }
 0x12f   :  { %v247_v7 = vsub.s32 0, %v245_v5  ;;  %v274_v32 = vadd.s32 3, %v270_v31  ;;  %v378_v33 = vand.u32 3, %v270_v31 }
 0x131   :  { %v678_v8 = vmin.u32 %v247_v7, %v245_v5  ;;  %v275_v34 = vand.u32 3, %v274_v32  ;;  %vm383_vm10 = vcmp.eq.s32.totalorder %v378_v33, 2  ;;  %vm380_vm12 = vcmp.eq.s32.totalorder %v378_v33, 0 }
 0x132   :  { %vm379_vm14 = vcmp.lt.s32.totalorder %v378_v33, 2 }
 0x133   :  { %v249_v10 = vclz %v678_v8  ;;  %vm280_vm11 = vcmp.eq.s32.totalorder %v275_v34, 2  ;;  %vm277_vm13 = vcmp.eq.s32.totalorder %v275_v34, 0  ;;  %vm276_vm15 = vcmp.lt.s32.totalorder %v275_v34, 2 }
 0x135   :  { %v679_v11 = vadd.s32 4294967294, %v249_v10 }
 0x137   :  { %vm680_vm7 = vcmp.lt.s32.totalorder %v679_v11, 0 }
 0x138   :  { %v252_v12 = vsel %vm680_vm7, 0, %v679_v11 }
 0x139   :  { %v253_v15 = vsub.s32 32, %v252_v12  ;;  %v257_v16 = vsub.s32 4294967266, %v252_v12  ;;  %v254_v17 = vshll.u32 %v245_v5, %v252_v12 }
 0x13b   :  { %v255_v18 = vshrl.u32 %v237_v13, %v253_v15  ;;  %v258_v19 = vadd.s32 127, %v257_v16  ;;  %v685_v15 = vld [vmem:[%s1108_s4] ss:$0 sm:$0xff] }
 0x13d   :  { %v256_v20 = vor.u32 %v255_v18, %v254_v17  ;;  %v259_v21 = vshll.u32 %v258_v19, 23 }
 0x13f   :  { %v260_v22 = vor.u32 4788187, %v259_v21  ;;  %v263_v24 = vcvt.s32.f32 %v256_v20 }
 0x141   :  { %v261_v23 = vand.u32 2147483647, %v260_v22 }
 0x143   :  { %v264_v25 = vmul.f32 %v263_v24, %v261_v23 }
 0x145   :  { %v265_v26 = vxor.u32 2147483648, %v264_v25 }
 0x147   :  { %v266_v28 = vsel %vm183_vm8, %v265_v26, %v264_v25 }
 0x148   :  { %v269_v29 = vsel %vm182_vm9, %v1058_v9, %v266_v28  ;;  %v177_v9 = vmul.f32 0.70710677, %v174_v50 }
 0x149   :  { %862 = vcosq.f32 %v269_v29 }
 0x14a   :  { %864 = vsinq.f32 %v269_v29 }
 0x14b   :  { %866 = verf.f32 %v177_v9 }
 0x156   :  { %v863_v35 = vpop.eup %862 }
 0x157   :  { %v865_v36 = vpop.eup %864  ;;  %v281_v38 = vxor.u32 2147483648, %v863_v35 }
 0x158   :  { %v278_v39 = vxor.u32 2147483648, %v865_v36  ;;  %v867_v61 = vpop.eup %866 }
 0x159   :  { %v385_v40 = vsel %vm383_vm10, %v281_v38, %v865_v36  ;;  %v282_v14 = vsel %vm280_vm11, %v281_v38, %v865_v36  ;;  %v179_v63 = vadd.f32 1.0, %v867_v61 }
 0x15a   :  { %v382_v41 = vsel %vm380_vm12, %v863_v35, %v278_v39  ;;  %v279_v42 = vsel %vm277_vm13, %v863_v35, %v278_v39 }
 0x15b   :  { %v386_v44 = vsel %vm379_vm14, %v382_v41, %v385_v40  ;;  %v283_v45 = vsel %vm276_vm15, %v279_v42, %v282_v14  ;;  %v180_v5 = vmul.f32 %v179_v63, %v176_v2 }
 0x15c   :  { %v387_v47 = vsel %vm273_vm1, nan, %v386_v44  ;;  %v284_v48 = vsel %vm273_vm1, nan, %v283_v45 }
 0x15d   :  { %770 = vmatmul.mubr.f32.vlgmr.msra.gmra.mxu1 %v387_v47  ;;  %805 = vmatmul.mubr.f32.vlgmr.msra.gmra.mxu0 %v284_v48 }
 0x15e   :  { %808 = vmatpush3.msra.mxu1 %v575_v46  ;;  %839 = vmatprep.mubr.msk.f32.mxu1 %vm964_vm0, %v963_v0 }
 0x15f   :  { %809 = vmatprep.subr.mxu1 %v963_v0 }
 0x160   :  { %810 = vmatpush3.msra.mxu1 %v574_v49 }
 0x161   :  { %811 = vmatprep.subr.mxu1 %v963_v0 }
 0x162   :  { %812 = vmatpush3.msra.mxu1 %v573_v51 }
 0x163   :  { %813 = vmatprep.subr.mxu1 %v963_v0 }
 0x164   :  { %814 = vmatpush3.msra.mxu1 %v572_v6 }
 0x165   :  { %815 = vmatprep.subr.mxu1 %v963_v0 }
 0x166   :  { %816 = vmatpush3.msra.mxu1 %v571_v52 }
 0x167   :  { %817 = vmatprep.subr.mxu1 %v963_v0 }
 0x168   :  { %818 = vmatpush3.msra.mxu1 %v570_v53 }
 0x169   :  { %819 = vmatprep.subr.mxu1 %v963_v0 }
 0x16a   :  { %820 = vmatpush3.msra.mxu1 %v569_v54 }
 0x16b   :  { %821 = vmatprep.subr.mxu1 %v963_v0 }
 0x16c   :  { %822 = vmatpush3.msra.mxu1 %v568_v55 }
 0x16d   :  { %823 = vmatprep.subr.mxu1 %v963_v0 }
 0x16e   :  { %824 = vmatpush3.msra.mxu1 %v567_v56 }
 0x16f   :  { %825 = vmatprep.subr.mxu1 %v963_v0 }
 0x170   :  { %826 = vmatpush3.msra.mxu1 %v566_v57 }
 0x171   :  { %827 = vmatprep.subr.mxu1 %v963_v0 }
 0x172   :  { %828 = vmatpush3.msra.mxu1 %v565_v58 }
 0x173   :  { %829 = vmatprep.subr.mxu1 %v963_v0 }
 0x174   :  { %830 = vmatpush3.msra.mxu1 %v564_v59 }
 0x175   :  { %831 = vmatprep.subr.mxu1 %v963_v0 }
 0x176   :  { %832 = vmatpush3.msra.mxu1 %v563_v60 }
 0x177   :  { %833 = vmatprep.subr.mxu1 %v963_v0 }
 0x178   :  { %834 = vmatpush3.msra.mxu1 %v562_v62 }
 0x179   :  { %835 = vmatprep.subr.mxu1 %v963_v0 }
 0x17a   :  { %836 = vmatpush3.msra.mxu1 %v561_v1 }
 0x17b   :  { %837 = vmatprep.subr.mxu1 %v963_v0 }
 0x17c   :  { %838 = vmatpush3.msra.mxu1 %v560_v3 }
 0x17d   :  { %840 = vmatmul.mubr.f32.vlgmr.msra.gmra.mxu1 %v180_v5 }
 0x21d   :  { %v486_v7 = vpop.f32.mrf.mxu1  ;;  %v556_v8 = vpop.f32.mrf.mxu0 }
 0x21e   :  { %v557_v12 = vadd.f32 %v556_v8, %v486_v7 }
 0x21f   :  { %v771_v10 = vpop.f32.mrf.mxu1  ;;  %v806_v11 = vpop.f32.mrf.mxu0 }
 0x23d   :  { %v642_v13 = vpop.f32.mrf.mxu1 }
 0x23e   :  { %v646_v16 = vadd.f32 %v642_v13, %v557_v12 }
 0x23f   :  { %v841_v17 = vpop.f32.mrf.mxu1 }
 0x240   :  { %v654_v18 = vadd.f32 %v685_v15, %v646_v16 }
 0x242   :  { %v656_v19 = vmul.f32 0.70710677, %v654_v18  ;;  %v655_v0 = vmul.f32 0.5, %v654_v18 }
 0x244   :  { %868 = verf.f32 %v656_v19 }
 0x251   :  { %v869_v20 = vpop.eup %868 }
 0x252   :  { %v658_v21 = vadd.f32 1.0, %v869_v20 }
 0x254   :  { %v659_v22 = vmul.f32 %v658_v21, %v655_v0 }
 0x256   :  { %660 = vst [vmem:[#allocation8] sm:$0xff] %v659_v22 }
 0x257   :  { %941 = shalt.err (!%p938_p5)
}
 0x258   :  { %670 = dma.vmem_to_hbm [thread:$0]  %s668_s13, 128, %s1109_s5, [#allocation4]  }
 0x259   :  { %954 = dma.done.wait [#allocation4], 128  }
 0x25a   :  { %955 = vsyncadd [#allocation4], 4294967168 }
 0x25b   :  { %674 = vsyncpa [#allocation3], 1 }
 0x25c   :  { %675 = vsyncpa [#allocation6], 1 }
 0x25d   :  { %676 = vsyncpa [#allocation4], 1 }

</bundles_post_ra>
